<compile_context>
chip_gen: v5e
topology: v5e:2x2
jax: 0.10.0
libtpu: 0.0.40
codegen_flags: <defaults>
</compile_context>

<pallas_src>
import functools

import jax
import jax.numpy as jnp
import numpy as np
from jax.experimental import pallas as pl
from jax.experimental.pallas import tpu as pltpu

EPS = 1e-5


def _round_up(a, b):
    return (a + b - 1) // b * b


@functools.lru_cache(maxsize=None)
def _vmem_limit_bytes():
    """Generation-aware VMEM budget: ~3/4 of physical VMEM (≈48 MiB on v7x's
    64 MiB/TC, ≈96 MiB on v5e/v6e's 128 MiB); safe fallback if unavailable."""
    try:
        phys = int(getattr(pltpu.get_tpu_info(), "vmem_capacity_bytes", 0))
    except Exception:
        phys = 0
    if phys <= 0:
        phys = 64 * 1024 * 1024
    return min((phys * 3) // 4, 112 * 1024 * 1024)


# ----------------------------------------------------------------------------
# Fused kernel: conv (single MXU matmul per tile) + BN stats + BN apply + ReLU
# ----------------------------------------------------------------------------
def conv_bn_fused_kernel(w_ref, gamma_ref, beta_ref, p_ref, out_ref,
                         acc_ref, sum_ref, sumsq_ref, *, m, tm, relu):
    # w_ref     : (Cout, Kp)  bf16, whole array resident (Kp = padded 9*Cin)
    # gamma/beta: (Cout, 1)   f32, resident
    # p_ref     : (Kp, tm)    bf16, one M tile of transposed im2col patches
    # out_ref   : (Cout, Mp)  resident output block, written once at the end
    # acc_ref   : (Cout, Mp)  f32 scratch, pre-BN conv output (resident)
    # sum/sumsq : (Cout, 1)   f32 scratch, per-channel stat accumulators
    i = pl.program_id(0)

    @pl.when(i == 0)
    def _():
        sum_ref[...] = jnp.zeros_like(sum_ref)
        sumsq_ref[...] = jnp.zeros_like(sumsq_ref)

    # Single MXU contraction over the padded 9*Cin axis for this M tile.
    y = jnp.dot(w_ref[...], p_ref[...], preferred_element_type=jnp.float32)
    col = pl.multiple_of(i * tm, tm)
    acc_ref[:, pl.ds(col, tm)] = y
    # Padded patch columns are zero -> contribute nothing to the stats.
    sum_ref[...] += jnp.sum(y, axis=1, keepdims=True)
    sumsq_ref[...] += jnp.sum(y * y, axis=1, keepdims=True)

    @pl.when(i == pl.num_programs(0) - 1)
    def _():
        mean = sum_ref[...] * (1.0 / m)
        var = jnp.maximum(sumsq_ref[...] * (1.0 / m) - mean * mean, 0.0)
        scale = gamma_ref[...] * jax.lax.rsqrt(var + EPS)
        shift = beta_ref[...] - mean * scale
        z = acc_ref[...] * scale + shift
        if relu:
            z = jnp.maximum(z, 0.0)
        out_ref[...] = z.astype(out_ref.dtype)


def conv_bn_fused(w_t, gamma2d, beta2d, p_t, *, m, tm, relu, out_dtype,
                  vmem_limit):
    cout, kp = w_t.shape
    mp = p_t.shape[1]
    nt = mp // tm
    # Deeper pipeline on the patches stream hides DMA latency (per-tile compute
    # is tiny vs the tile DMA); only meaningful once the grid is long enough.
    if nt >= 3:
        p_spec = pl.BlockSpec((kp, tm), lambda i: (0, i),
                              pipeline_mode=pl.Buffered(3))
    else:
        p_spec = pl.BlockSpec((kp, tm), lambda i: (0, i))
    kernel = functools.partial(conv_bn_fused_kernel, m=m, tm=tm, relu=relu)
    return pl.pallas_call(
        kernel,
        out_shape=jax.ShapeDtypeStruct((cout, mp), out_dtype),
        grid_spec=pltpu.PrefetchScalarGridSpec(
            num_scalar_prefetch=0,
            grid=(nt,),
            in_specs=[
                pl.BlockSpec((cout, kp), lambda i: (0, 0)),   # weights (resident)
                pl.BlockSpec((cout, 1), lambda i: (0, 0)),    # gamma
                pl.BlockSpec((cout, 1), lambda i: (0, 0)),    # beta
                p_spec,                                       # patches tile
            ],
            out_specs=pl.BlockSpec((cout, mp), lambda i: (0, 0)),  # resident, 1 write
            scratch_shapes=[
                pltpu.VMEM((cout, mp), jnp.float32),  # pre-BN conv output
                pltpu.VMEM((cout, 1), jnp.float32),   # per-channel sum
                pltpu.VMEM((cout, 1), jnp.float32),   # per-channel sum of squares
            ],
        ),
        compiler_params=pltpu.CompilerParams(
            # Resident output + stat accumulators -> M axis is a reduction.
            # (Single TC on v7x; the big-shape fallback path runs "parallel".)
            dimension_semantics=("arbitrary",),
            vmem_limit_bytes=vmem_limit,
        ),
    )(w_t, gamma2d, beta2d, p_t)


# ----------------------------------------------------------------------------
# Fallback path (only when the resident output does not fit VMEM):
#   kernel 1: matmul + per-tile partial stats (parallel), bf16 intermediate
#   kernel 2: BN apply (+ReLU), parallel tiles
# ----------------------------------------------------------------------------
def conv_stats_kernel(w_ref, p_ref, out_ref, psum_ref, psumsq_ref):
    y = jnp.dot(w_ref[...], p_ref[...], preferred_element_type=jnp.float32)
    out_ref[...] = y.astype(out_ref.dtype)       # bf16 intermediate (half HBM)
    psum_ref[0] = jnp.sum(y, axis=1, keepdims=True)
    psumsq_ref[0] = jnp.sum(y * y, axis=1, keepdims=True)


def conv_stats(w_t, p_t, tm, *, vmem_limit):
    cout, kp = w_t.shape
    mp = p_t.shape[1]
    nt = mp // tm
    return pl.pallas_call(
        conv_stats_kernel,
        out_shape=(
            jax.ShapeDtypeStruct((cout, mp), jnp.bfloat16),
            jax.ShapeDtypeStruct((nt, cout, 1), jnp.float32),
            jax.ShapeDtypeStruct((nt, cout, 1), jnp.float32),
        ),
        grid_spec=pltpu.PrefetchScalarGridSpec(
            num_scalar_prefetch=0,
            grid=(nt,),
            in_specs=[
                pl.BlockSpec((cout, kp), lambda i: (0, 0)),
                pl.BlockSpec((kp, tm), lambda i: (0, i)),
            ],
            out_specs=[
                pl.BlockSpec((cout, tm), lambda i: (0, i)),
                pl.BlockSpec((1, cout, 1), lambda i: (i, 0, 0)),
                pl.BlockSpec((1, cout, 1), lambda i: (i, 0, 0)),
            ],
        ),
        compiler_params=pltpu.CompilerParams(
            dimension_semantics=("parallel",),   # per-tile partials -> 2 TCs on v7x
            vmem_limit_bytes=vmem_limit,
        ),
    )(w_t, p_t)


def bn_apply_kernel(scale_ref, shift_ref, x_ref, out_ref, *, relu):
    y = x_ref[...].astype(jnp.float32) * scale_ref[...] + shift_ref[...]
    if relu:
        y = jnp.maximum(y, 0.0)
    out_ref[...] = y.astype(out_ref.dtype)


def bn_apply(x_t, scale, shift, tm, *, relu, out_dtype, vmem_limit):
    cout, mp = x_t.shape
    return pl.pallas_call(
        functools.partial(bn_apply_kernel, relu=relu),
        out_shape=jax.ShapeDtypeStruct((cout, mp), out_dtype),
        grid_spec=pltpu.PrefetchScalarGridSpec(
            num_scalar_prefetch=0,
            grid=(mp // tm,),
            in_specs=[
                pl.BlockSpec((cout, 1), lambda i: (0, 0)),
                pl.BlockSpec((cout, 1), lambda i: (0, 0)),
                pl.BlockSpec((cout, tm), lambda i: (0, i)),
            ],
            out_specs=pl.BlockSpec((cout, tm), lambda i: (0, i)),
        ),
        compiler_params=pltpu.CompilerParams(
            dimension_semantics=("parallel",),
            vmem_limit_bytes=vmem_limit,
        ),
    )(scale, shift, x_t)


# ----------------------------------------------------------------------------
# Glue: transposed im2col, weight repack, BN affine fold, tiling choice
# ----------------------------------------------------------------------------
def _choose_m_tiling(m, kp, cout, vmem_limit):
    """Pick (padded M, tile width): minimize padding waste first, then prefer
    the widest lane tile (up to 2048) whose buffers fit the VMEM budget."""
    mp128 = _round_up(m, 128)
    budget = max(vmem_limit // 4, 1 << 20)
    cands = []
    for tm in (2048, 1024, 512, 384, 256, 128):
        if tm > mp128:
            continue
        if 3 * kp * tm * 2 + cout * tm * 8 > budget:   # patches bufs + out tile
            continue
        cands.append((tm, _round_up(m, tm)))
    if not cands:
        return mp128, 128
    min_waste = min(mp - m for _, mp in cands)
    allowed = max(min_waste, m // 16)                  # tolerate <=6% padding
    tm, mp = max((c for c in cands if c[1] - m <= allowed), key=lambda c: c[0])
    return mp, tm


def extract_patches_t(x_cnhw, stride):
    # (C, N, H, W) channel-first -> transposed im2col (9*C, N*Ho*Wo).
    # TODO(synk): form the 3x3 taps in-kernel via a halo row-slab DMA
    # (manual make_async_copy) to avoid this 9x-inflated HBM patches tensor —
    # the single largest remaining HBM-traffic item.
    c, n, h, w = x_cnhw.shape
    xp = jnp.pad(x_cnhw, ((0, 0), (0, 0), (1, 1), (1, 1)))
    ho = (h + 2 - 3) // stride + 1
    wo = (w + 2 - 3) // stride + 1
    taps = []
    for ky in range(3):
        for kx in range(3):
            taps.append(
                xp[
                    :,
                    :,
                    ky : ky + (ho - 1) * stride + 1 : stride,
                    kx : kx + (wo - 1) * stride + 1 : stride,
                ]
            )
    p = jnp.stack(taps, axis=0).reshape(9 * c, n * ho * wo)
    return p, ho, wo


def conv_weight_t(w_oihw, k_pad):
    # (Cout, Cin, 3, 3) -> (Cout, 9*Cin) tap-major/channel-minor, zero-padded
    # along the contraction dim, bf16 MXU operand.
    cout, cin = w_oihw.shape[0], w_oihw.shape[1]
    w = jnp.transpose(w_oihw, (0, 2, 3, 1)).reshape(cout, 9 * cin)
    w = jnp.pad(w, ((0, 0), (0, k_pad - 9 * cin)))
    return w.astype(jnp.bfloat16)


def _bn_affine(s, ss, m, gamma2d, beta2d):
    mean = s / m
    var = jnp.maximum(ss / m - mean * mean, 0.0)
    scale = gamma2d * jax.lax.rsqrt(var + EPS)
    shift = beta2d - mean * scale
    return scale, shift


def _conv_bn(x_cnhw, w_oihw, gamma, beta, stride, *, relu, out_dtype,
             vmem_limit, force_two_pass=False):
    cout, cin = w_oihw.shape[0], w_oihw.shape[1]
    n = x_cnhw.shape[1]
    p, ho, wo = extract_patches_t(x_cnhw.astype(jnp.bfloat16), stride)
    m = n * ho * wo
    kp = _round_up(9 * cin, 16)
    mp, tm = _choose_m_tiling(m, kp, cout, vmem_limit)
    p = jnp.pad(p, ((0, kp - 9 * cin), (0, mp - m)))  # zero cols: stats-safe
    w_t = conv_weight_t(w_oihw, kp)
    g2 = gamma.reshape(-1, 1).astype(jnp.float32)
    b2 = beta.reshape(-1, 1).astype(jnp.float32)

    out_bytes = np.dtype(out_dtype).itemsize
    resident = (cout * mp * (4 + out_bytes)       # f32 acc + resident output
                + cout * kp * 2                   # weights
                + 3 * kp * tm * 2                 # patches pipeline buffers
                + (1 << 14))                      # headroom
    if (not force_two_pass) and resident <= (vmem_limit * 3) // 5:
        # Fully fused: conv + stats + BN(+ReLU), one HBM write of the output.
        y = conv_bn_fused(w_t, g2, b2, p, m=m, tm=tm, relu=relu,
                          out_dtype=out_dtype, vmem_limit=vmem_limit)
    else:
        # Two-pass fallback: bf16 intermediate, parallel per-tile partial stats.
        a, ps, pss = conv_stats(w_t, p, tm, vmem_limit=vmem_limit)
        scale, shift = _bn_affine(ps.sum(axis=0), pss.sum(axis=0), m, g2, b2)
        y = bn_apply(a, scale, shift, tm, relu=relu, out_dtype=out_dtype,
                     vmem_limit=vmem_limit)
    return y[:, :m].reshape(cout, n, ho, wo)


# ----------------------------------------------------------------------------
# Full ResNetBlock forward (input/output are NCHW like PyTorch)
# ----------------------------------------------------------------------------
def resnet_block_forward(x_nchw, params, stride, force_two_pass=False):
    w1, b1, g1, be1, w2, g2, be2 = params
    del b1  # per-channel bias before training-mode BN cancels exactly
    vmem_limit = _vmem_limit_bytes()
    # TODO(synk): fold the NCHW<->channel-first transposes and the layer1->
    # layer2 hand-off into the kernels (grid over (N, HW tiles) + halo DMA) so
    # activations take no extra XLA transpose / im2col passes.
    x_t = jnp.transpose(x_nchw, (1, 0, 2, 3))  # (Cin, N, H, W) channel-first
    y1 = _conv_bn(x_t, w1, g1, be1, stride, relu=True, out_dtype=jnp.bfloat16,
                  vmem_limit=vmem_limit, force_two_pass=force_two_pass)
    y2 = _conv_bn(y1, w2, g2, be2, 1, relu=False, out_dtype=jnp.float32,
                  vmem_limit=vmem_limit, force_two_pass=force_two_pass)
    # NOTE: the reference forward never adds `identity`, so neither do we.
    return jnp.transpose(y2, (1, 0, 2, 3))  # (N, Cout, Hout, Wout)


# ----------------------------------------------------------------------------
# Pure-JAX f32 reference for verification
# ----------------------------------------------------------------------------
def ref_forward(x, params, stride):
    w1, b1, g1, be1, w2, g2, be2 = params
    dn = ("NCHW", "OIHW", "NCHW")

    def bn(h, gamma, beta):
        mean = h.mean(axis=(0, 2, 3), keepdims=True)
        var = ((h - mean) ** 2).mean(axis=(0, 2, 3), keepdims=True)
        return (h - mean) * jax.lax.rsqrt(var + EPS) * gamma[None, :, None, None] + beta[
            None, :, None, None
        ]

    h = jax.lax.conv_general_dilated(
        x, w1, (stride, stride), ((1, 1), (1, 1)), dimension_numbers=dn
    )
    h = h + b1[None, :, None, None]
    h = jnp.maximum(bn(h, g1, be1), 0.0)
    h = jax.lax.conv_general_dilated(h, w2, (1, 1), ((1, 1), (1, 1)), dimension_numbers=dn)
    return bn(h, g2, be2)


if __name__ == "__main__":
    # Small shapes consistent with the module: N=2, Cin=4, Cout=8, 16x16, stride=2.
    N, Cin, Cout, H, W, stride = 2, 4, 8, 16, 16, 2

    key = jax.random.PRNGKey(0)
    ks = jax.random.split(key, 8)
    x = jax.random.normal(ks[0], (N, Cin, H, W), jnp.float32)
    w1 = jax.random.normal(ks[1], (Cout, Cin, 3, 3), jnp.float32) * 0.1
    b1 = jax.random.normal(ks[2], (Cout,), jnp.float32) * 0.1
    g1 = 1.0 + 0.1 * jax.random.normal(ks[3], (Cout,), jnp.float32)
    be1 = 0.1 * jax.random.normal(ks[4], (Cout,), jnp.float32)
    w2 = jax.random.normal(ks[5], (Cout, Cout, 3, 3), jnp.float32) * 0.1
    g2 = 1.0 + 0.1 * jax.random.normal(ks[6], (Cout,), jnp.float32)
    be2 = 0.1 * jax.random.normal(ks[7], (Cout,), jnp.float32)
    params = (w1, b1, g1, be1, w2, g2, be2)

    fwd = jax.jit(resnet_block_forward,
                  static_argnames=("stride", "force_two_pass"))
    ref = jax.block_until_ready(ref_forward(x, params, stride))

    # Primary (fully fused) path.
    out = jax.block_until_ready(fwd(x, params, stride=stride))
    np.testing.assert_allclose(np.asarray(out), np.asarray(ref), rtol=5e-2, atol=5e-2)
    assert out.shape == (N, Cout, H // stride, W // stride)

    # Also exercise the large-shape fallback path (bf16 intermediate,
    # parallel per-tile partial stats) so both code paths are validated.
    out2 = jax.block_until_ready(fwd(x, params, stride=stride, force_two_pass=True))
    np.testing.assert_allclose(np.asarray(out2), np.asarray(ref), rtol=5e-2, atol=5e-2)

    print("KERNEL_OK")
</pallas_src>

<mosaic_0001>
module attributes {stable_mosaic.version = 11 : i64} {
  func.func @conv_bn_fused_kernel(%arg0: i32, %arg1: memref<8x48xbf16, #tpu.memory_space<vmem>>, %arg2: memref<8x1xf32, #tpu.memory_space<vmem>>, %arg3: memref<8x1xf32, #tpu.memory_space<vmem>>, %arg4: memref<48x128xbf16, #tpu.memory_space<vmem>>, %arg5: memref<8x128xbf16, #tpu.memory_space<vmem>>, %arg6: memref<8x128xf32, #tpu.memory_space<vmem>>, %arg7: memref<8x1xf32, #tpu.memory_space<vmem>>, %arg8: memref<8x1xf32, #tpu.memory_space<vmem>>) attributes {dimension_semantics = [#tpu.dimension_semantics<arbitrary>], iteration_bounds = array<i64: 1>, scalar_prefetch = 0 : i64, scratch_operands = 3 : i64, tpu.core_type = #tpu.core_type<tc>, window_params = [{pipeline_mode = #tpu.pipeline_mode<synchronous>, transform_indices = @transform_0, window_bounds = array<i64: 8, 48>}, {pipeline_mode = #tpu.pipeline_mode<synchronous>, transform_indices = @transform_1, window_bounds = array<i64: 8, 1>}, {pipeline_mode = #tpu.pipeline_mode<synchronous>, transform_indices = @transform_2, window_bounds = array<i64: 8, 1>}, {transform_indices = @transform_3, window_bounds = array<i64: 48, 128>}, {pipeline_mode = #tpu.pipeline_mode<synchronous>, transform_indices = @transform_4, window_bounds = array<i64: 8, 128>}]} {
    %c0_i32 = arith.constant 0 : i32
    %0 = arith.cmpi eq, %arg0, %c0_i32 : i32
    %1 = arith.extui %0 : i1 to i32
    %c0_i32_0 = arith.constant 0 : i32
    %2 = arith.cmpi ne, %1, %c0_i32_0 : i32
    scf.if %2 {
      %cst_17 = arith.constant 0.000000e+00 : f32
      %24 = vector.broadcast %cst_17 : f32 to vector<8x1xf32>
      %c0_18 = arith.constant 0 : index
      %c0_19 = arith.constant 0 : index
      %25 = vector.load %arg7[%c0_18, %c0_19] : memref<8x1xf32, #tpu.memory_space<vmem>>, vector<8x1xf32>
      tpu.vector_store %arg7[%c0_18, %c0_19], %24 {strides = array<i32>} : memref<8x1xf32, #tpu.memory_space<vmem>>, vector<8x1xf32>,
      %cst_20 = arith.constant 0.000000e+00 : f32
      %26 = vector.broadcast %cst_20 : f32 to vector<8x1xf32>
      %c0_21 = arith.constant 0 : index
      %c0_22 = arith.constant 0 : index
      %27 = vector.load %arg8[%c0_21, %c0_22] : memref<8x1xf32, #tpu.memory_space<vmem>>, vector<8x1xf32>
      tpu.vector_store %arg8[%c0_21, %c0_22], %26 {strides = array<i32>} : memref<8x1xf32, #tpu.memory_space<vmem>>, vector<8x1xf32>,
    } else {
    }
    %c0 = arith.constant 0 : index
    %c0_1 = arith.constant 0 : index
    %3 = vector.load %arg1[%c0, %c0_1] : memref<8x48xbf16, #tpu.memory_space<vmem>>, vector<8x48xbf16>
    %c0_2 = arith.constant 0 : index
    %c0_3 = arith.constant 0 : index
    %4 = vector.load %arg4[%c0_2, %c0_3] : memref<48x128xbf16, #tpu.memory_space<vmem>>, vector<48x128xbf16>
    %cst = arith.constant dense<0.000000e+00> : vector<8x128xf32>
    %5 = tpu.matmul %3, %4, %cst {dimension_numbers = #tpu.dot_dimension_numbers<[1], [0], [0], [1], [0, 0, 1, 1], [], []>} : vector<8x48xbf16>, vector<48x128xbf16>, vector<8x128xf32> -> vector<8x128xf32>
    %c128_i32 = arith.constant 128 : i32
    %6 = arith.muli %arg0, %c128_i32 : i32
    %7 = tpu.assume_multiple %6, 128 : i32
    %c0_4 = arith.constant 0 : index
    %8 = arith.index_cast %7 : i32 to index
    %9 = vector.load %arg6[%c0_4, %8] : memref<8x128xf32, #tpu.memory_space<vmem>>, vector<8x128xf32>
    tpu.vector_store %arg6[%c0_4, %8], %5 {strides = array<i32>} : memref<8x128xf32, #tpu.memory_space<vmem>>, vector<8x128xf32>,
    %c0_5 = arith.constant 0 : index
    %c0_6 = arith.constant 0 : index
    %10 = vector.load %arg7[%c0_5, %c0_6] : memref<8x1xf32, #tpu.memory_space<vmem>>, vector<8x1xf32>
    %cst_7 = arith.constant dense<0.000000e+00> : vector<8xf32>
    %11 = vector.multi_reduction <add>, %5, %cst_7 [1] : vector<8x128xf32> to vector<8xf32>
    %12 = vector.shape_cast %11 : vector<8xf32> to vector<8x1xf32>
    %13 = arith.addf %10, %12 : vector<8x1xf32>
    %c0_8 = arith.constant 0 : index
    %c0_9 = arith.constant 0 : index
    %14 = vector.load %arg7[%c0_8, %c0_9] : memref<8x1xf32, #tpu.memory_space<vmem>>, vector<8x1xf32>
    tpu.vector_store %arg7[%c0_8, %c0_9], %13 {strides = array<i32>} : memref<8x1xf32, #tpu.memory_space<vmem>>, vector<8x1xf32>,
    %c0_10 = arith.constant 0 : index
    %c0_11 = arith.constant 0 : index
    %15 = vector.load %arg8[%c0_10, %c0_11] : memref<8x1xf32, #tpu.memory_space<vmem>>, vector<8x1xf32>
    %16 = arith.mulf %5, %5 : vector<8x128xf32>
    %cst_12 = arith.constant dense<0.000000e+00> : vector<8xf32>
    %17 = vector.multi_reduction <add>, %16, %cst_12 [1] : vector<8x128xf32> to vector<8xf32>
    %18 = vector.shape_cast %17 : vector<8xf32> to vector<8x1xf32>
    %19 = arith.addf %15, %18 : vector<8x1xf32>
    %c0_13 = arith.constant 0 : index
    %c0_14 = arith.constant 0 : index
    %20 = vector.load %arg8[%c0_13, %c0_14] : memref<8x1xf32, #tpu.memory_space<vmem>>, vector<8x1xf32>
    tpu.vector_store %arg8[%c0_13, %c0_14], %19 {strides = array<i32>} : memref<8x1xf32, #tpu.memory_space<vmem>>, vector<8x1xf32>,
    %c0_i32_15 = arith.constant 0 : i32
    %21 = arith.cmpi eq, %arg0, %c0_i32_15 : i32
    %22 = arith.extui %21 : i1 to i32
    %c0_i32_16 = arith.constant 0 : i32
    %23 = arith.cmpi ne, %22, %c0_i32_16 : i32
    scf.if %23 {
      %c0_17 = arith.constant 0 : index
      %c0_18 = arith.constant 0 : index
      %24 = vector.load %arg7[%c0_17, %c0_18] : memref<8x1xf32, #tpu.memory_space<vmem>>, vector<8x1xf32>
      %cst_19 = arith.constant 7.812500e-03 : f32
      %25 = vector.broadcast %cst_19 : f32 to vector<8x1xf32>
      %26 = arith.mulf %24, %25 : vector<8x1xf32>
      %c0_20 = arith.constant 0 : index
      %c0_21 = arith.constant 0 : index
      %27 = vector.load %arg8[%c0_20, %c0_21] : memref<8x1xf32, #tpu.memory_space<vmem>>, vector<8x1xf32>
      %cst_22 = arith.constant 7.812500e-03 : f32
      %28 = vector.broadcast %cst_22 : f32 to vector<8x1xf32>
      %29 = arith.mulf %27, %28 : vector<8x1xf32>
      %30 = arith.mulf %26, %26 : vector<8x1xf32>
      %31 = arith.subf %29, %30 : vector<8x1xf32>
      %cst_23 = arith.constant 0.000000e+00 : f32
      %32 = vector.broadcast %cst_23 : f32 to vector<8x1xf32>
      %33 = arith.maximumf %31, %32 : vector<8x1xf32>
      %c0_24 = arith.constant 0 : index
      %c0_25 = arith.constant 0 : index
      %34 = vector.load %arg2[%c0_24, %c0_25] : memref<8x1xf32, #tpu.memory_space<vmem>>, vector<8x1xf32>
      %cst_26 = arith.constant 9.99999974E-6 : f32
      %35 = vector.broadcast %cst_26 : f32 to vector<8x1xf32>
      %36 = arith.addf %33, %35 : vector<8x1xf32>
      %37 = math.rsqrt %36 : vector<8x1xf32>
      %38 = arith.mulf %34, %37 : vector<8x1xf32>
      %c0_27 = arith.constant 0 : index
      %c0_28 = arith.constant 0 : index
      %39 = vector.load %arg3[%c0_27, %c0_28] : memref<8x1xf32, #tpu.memory_space<vmem>>, vector<8x1xf32>
      %40 = arith.mulf %26, %38 : vector<8x1xf32>
      %41 = arith.subf %39, %40 : vector<8x1xf32>
      %c0_29 = arith.constant 0 : index
      %c0_30 = arith.constant 0 : index
      %42 = vector.load %arg6[%c0_29, %c0_30] : memref<8x128xf32, #tpu.memory_space<vmem>>, vector<8x128xf32>
      %43 = vector.broadcast %38 : vector<8x1xf32> to vector<8x128xf32>
      %44 = arith.mulf %42, %43 : vector<8x128xf32>
      %45 = vector.broadcast %41 : vector<8x1xf32> to vector<8x128xf32>
      %46 = arith.addf %44, %45 : vector<8x128xf32>
      %cst_31 = arith.constant 0.000000e+00 : f32
      %47 = vector.broadcast %cst_31 : f32 to vector<8x128xf32>
      %48 = arith.maximumf %46, %47 : vector<8x128xf32>
      %49 = arith.truncf %48 : vector<8x128xf32> to vector<8x128xbf16>
      %c0_32 = arith.constant 0 : index
      %c0_33 = arith.constant 0 : index
      %50 = vector.load %arg5[%c0_32, %c0_33] : memref<8x128xbf16, #tpu.memory_space<vmem>>, vector<8x128xbf16>
      tpu.vector_store %arg5[%c0_32, %c0_33], %49 {strides = array<i32>} : memref<8x128xbf16, #tpu.memory_space<vmem>>, vector<8x128xbf16>,
    } else {
    }
    return
  }
  func.func @transform_0(%arg0: i32) -> (i32, i32) {
    %c0_i32 = arith.constant 0 : i32
    %c0_i32_0 = arith.constant 0 : i32
    %c0_i32_1 = arith.constant 0 : i32
    return %c0_i32, %c0_i32_0 : i32, i32
  }
  func.func @transform_1(%arg0: i32) -> (i32, i32) {
    %c0_i32 = arith.constant 0 : i32
    %c0_i32_0 = arith.constant 0 : i32
    %c0_i32_1 = arith.constant 0 : i32
    return %c0_i32, %c0_i32_0 : i32, i32
  }
  func.func @transform_2(%arg0: i32) -> (i32, i32) {
    %c0_i32 = arith.constant 0 : i32
    %c0_i32_0 = arith.constant 0 : i32
    %c0_i32_1 = arith.constant 0 : i32
    return %c0_i32, %c0_i32_0 : i32, i32
  }
  func.func @transform_3(%arg0: i32) -> (i32, i32) {
    %c0_i32 = arith.constant 0 : i32
    %c0_i32_0 = arith.constant 0 : i32
    return %c0_i32, %arg0 : i32, i32
  }
  func.func @transform_4(%arg0: i32) -> (i32, i32) {
    %c0_i32 = arith.constant 0 : i32
    %c0_i32_0 = arith.constant 0 : i32
    %c0_i32_1 = arith.constant 0 : i32
    return %c0_i32, %c0_i32_0 : i32, i32
  }
}

module attributes {stable_mosaic.version = 11 : i64} {
  func.func @conv_bn_fused_kernel(%arg0: i32, %arg1: memref<8x80xbf16, #tpu.memory_space<vmem>>, %arg2: memref<8x1xf32, #tpu.memory_space<vmem>>, %arg3: memref<8x1xf32, #tpu.memory_space<vmem>>, %arg4: memref<80x128xbf16, #tpu.memory_space<vmem>>, %arg5: memref<8x128xf32, #tpu.memory_space<vmem>>, %arg6: memref<8x128xf32, #tpu.memory_space<vmem>>, %arg7: memref<8x1xf32, #tpu.memory_space<vmem>>, %arg8: memref<8x1xf32, #tpu.memory_space<vmem>>) attributes {dimension_semantics = [#tpu.dimension_semantics<arbitrary>], iteration_bounds = array<i64: 1>, scalar_prefetch = 0 : i64, scratch_operands = 3 : i64, tpu.core_type = #tpu.core_type<tc>, window_params = [{pipeline_mode = #tpu.pipeline_mode<synchronous>, transform_indices = @transform_0, window_bounds = array<i64: 8, 80>}, {pipeline_mode = #tpu.pipeline_mode<synchronous>, transform_indices = @transform_1, window_bounds = array<i64: 8, 1>}, {pipeline_mode = #tpu.pipeline_mode<synchronous>, transform_indices = @transform_2, window_bounds = array<i64: 8, 1>}, {transform_indices = @transform_3, window_bounds = array<i64: 80, 128>}, {pipeline_mode = #tpu.pipeline_mode<synchronous>, transform_indices = @transform_4, window_bounds = array<i64: 8, 128>}]} {
    %c0_i32 = arith.constant 0 : i32
    %0 = arith.cmpi eq, %arg0, %c0_i32 : i32
    %1 = arith.extui %0 : i1 to i32
    %c0_i32_0 = arith.constant 0 : i32
    %2 = arith.cmpi ne, %1, %c0_i32_0 : i32
    scf.if %2 {
      %cst_17 = arith.constant 0.000000e+00 : f32
      %24 = vector.broadcast %cst_17 : f32 to vector<8x1xf32>
      %c0_18 = arith.constant 0 : index
      %c0_19 = arith.constant 0 : index
      %25 = vector.load %arg7[%c0_18, %c0_19] : memref<8x1xf32, #tpu.memory_space<vmem>>, vector<8x1xf32>
      tpu.vector_store %arg7[%c0_18, %c0_19], %24 {strides = array<i32>} : memref<8x1xf32, #tpu.memory_space<vmem>>, vector<8x1xf32>,
      %cst_20 = arith.constant 0.000000e+00 : f32
      %26 = vector.broadcast %cst_20 : f32 to vector<8x1xf32>
      %c0_21 = arith.constant 0 : index
      %c0_22 = arith.constant 0 : index
      %27 = vector.load %arg8[%c0_21, %c0_22] : memref<8x1xf32, #tpu.memory_space<vmem>>, vector<8x1xf32>
      tpu.vector_store %arg8[%c0_21, %c0_22], %26 {strides = array<i32>} : memref<8x1xf32, #tpu.memory_space<vmem>>, vector<8x1xf32>,
    } else {
    }
    %c0 = arith.constant 0 : index
    %c0_1 = arith.constant 0 : index
    %3 = vector.load %arg1[%c0, %c0_1] : memref<8x80xbf16, #tpu.memory_space<vmem>>, vector<8x80xbf16>
    %c0_2 = arith.constant 0 : index
    %c0_3 = arith.constant 0 : index
    %4 = vector.load %arg4[%c0_2, %c0_3] : memref<80x128xbf16, #tpu.memory_space<vmem>>, vector<80x128xbf16>
    %cst = arith.constant dense<0.000000e+00> : vector<8x128xf32>
    %5 = tpu.matmul %3, %4, %cst {dimension_numbers = #tpu.dot_dimension_numbers<[1], [0], [0], [1], [0, 0, 1, 1], [], []>} : vector<8x80xbf16>, vector<80x128xbf16>, vector<8x128xf32> -> vector<8x128xf32>
    %c128_i32 = arith.constant 128 : i32
    %6 = arith.muli %arg0, %c128_i32 : i32
    %7 = tpu.assume_multiple %6, 128 : i32
    %c0_4 = arith.constant 0 : index
    %8 = arith.index_cast %7 : i32 to index
    %9 = vector.load %arg6[%c0_4, %8] : memref<8x128xf32, #tpu.memory_space<vmem>>, vector<8x128xf32>
    tpu.vector_store %arg6[%c0_4, %8], %5 {strides = array<i32>} : memref<8x128xf32, #tpu.memory_space<vmem>>, vector<8x128xf32>,
    %c0_5 = arith.constant 0 : index
    %c0_6 = arith.constant 0 : index
    %10 = vector.load %arg7[%c0_5, %c0_6] : memref<8x1xf32, #tpu.memory_space<vmem>>, vector<8x1xf32>
    %cst_7 = arith.constant dense<0.000000e+00> : vector<8xf32>
    %11 = vector.multi_reduction <add>, %5, %cst_7 [1] : vector<8x128xf32> to vector<8xf32>
    %12 = vector.shape_cast %11 : vector<8xf32> to vector<8x1xf32>
    %13 = arith.addf %10, %12 : vector<8x1xf32>
    %c0_8 = arith.constant 0 : index
    %c0_9 = arith.constant 0 : index
    %14 = vector.load %arg7[%c0_8, %c0_9] : memref<8x1xf32, #tpu.memory_space<vmem>>, vector<8x1xf32>
    tpu.vector_store %arg7[%c0_8, %c0_9], %13 {strides = array<i32>} : memref<8x1xf32, #tpu.memory_space<vmem>>, vector<8x1xf32>,
    %c0_10 = arith.constant 0 : index
    %c0_11 = arith.constant 0 : index
    %15 = vector.load %arg8[%c0_10, %c0_11] : memref<8x1xf32, #tpu.memory_space<vmem>>, vector<8x1xf32>
    %16 = arith.mulf %5, %5 : vector<8x128xf32>
    %cst_12 = arith.constant dense<0.000000e+00> : vector<8xf32>
    %17 = vector.multi_reduction <add>, %16, %cst_12 [1] : vector<8x128xf32> to vector<8xf32>
    %18 = vector.shape_cast %17 : vector<8xf32> to vector<8x1xf32>
    %19 = arith.addf %15, %18 : vector<8x1xf32>
    %c0_13 = arith.constant 0 : index
    %c0_14 = arith.constant 0 : index
    %20 = vector.load %arg8[%c0_13, %c0_14] : memref<8x1xf32, #tpu.memory_space<vmem>>, vector<8x1xf32>
    tpu.vector_store %arg8[%c0_13, %c0_14], %19 {strides = array<i32>} : memref<8x1xf32, #tpu.memory_space<vmem>>, vector<8x1xf32>,
    %c0_i32_15 = arith.constant 0 : i32
    %21 = arith.cmpi eq, %arg0, %c0_i32_15 : i32
    %22 = arith.extui %21 : i1 to i32
    %c0_i32_16 = arith.constant 0 : i32
    %23 = arith.cmpi ne, %22, %c0_i32_16 : i32
    scf.if %23 {
      %c0_17 = arith.constant 0 : index
      %c0_18 = arith.constant 0 : index
      %24 = vector.load %arg7[%c0_17, %c0_18] : memref<8x1xf32, #tpu.memory_space<vmem>>, vector<8x1xf32>
      %cst_19 = arith.constant 7.812500e-03 : f32
      %25 = vector.broadcast %cst_19 : f32 to vector<8x1xf32>
      %26 = arith.mulf %24, %25 : vector<8x1xf32>
      %c0_20 = arith.constant 0 : index
      %c0_21 = arith.constant 0 : index
      %27 = vector.load %arg8[%c0_20, %c0_21] : memref<8x1xf32, #tpu.memory_space<vmem>>, vector<8x1xf32>
      %cst_22 = arith.constant 7.812500e-03 : f32
      %28 = vector.broadcast %cst_22 : f32 to vector<8x1xf32>
      %29 = arith.mulf %27, %28 : vector<8x1xf32>
      %30 = arith.mulf %26, %26 : vector<8x1xf32>
      %31 = arith.subf %29, %30 : vector<8x1xf32>
      %cst_23 = arith.constant 0.000000e+00 : f32
      %32 = vector.broadcast %cst_23 : f32 to vector<8x1xf32>
      %33 = arith.maximumf %31, %32 : vector<8x1xf32>
      %c0_24 = arith.constant 0 : index
      %c0_25 = arith.constant 0 : index
      %34 = vector.load %arg2[%c0_24, %c0_25] : memref<8x1xf32, #tpu.memory_space<vmem>>, vector<8x1xf32>
      %cst_26 = arith.constant 9.99999974E-6 : f32
      %35 = vector.broadcast %cst_26 : f32 to vector<8x1xf32>
      %36 = arith.addf %33, %35 : vector<8x1xf32>
      %37 = math.rsqrt %36 : vector<8x1xf32>
      %38 = arith.mulf %34, %37 : vector<8x1xf32>
      %c0_27 = arith.constant 0 : index
      %c0_28 = arith.constant 0 : index
      %39 = vector.load %arg3[%c0_27, %c0_28] : memref<8x1xf32, #tpu.memory_space<vmem>>, vector<8x1xf32>
      %40 = arith.mulf %26, %38 : vector<8x1xf32>
      %41 = arith.subf %39, %40 : vector<8x1xf32>
      %c0_29 = arith.constant 0 : index
      %c0_30 = arith.constant 0 : index
      %42 = vector.load %arg6[%c0_29, %c0_30] : memref<8x128xf32, #tpu.memory_space<vmem>>, vector<8x128xf32>
      %43 = vector.broadcast %38 : vector<8x1xf32> to vector<8x128xf32>
      %44 = arith.mulf %42, %43 : vector<8x128xf32>
      %45 = vector.broadcast %41 : vector<8x1xf32> to vector<8x128xf32>
      %46 = arith.addf %44, %45 : vector<8x128xf32>
      %c0_31 = arith.constant 0 : index
      %c0_32 = arith.constant 0 : index
      %47 = vector.load %arg5[%c0_31, %c0_32] : memref<8x128xf32, #tpu.memory_space<vmem>>, vector<8x128xf32>
      tpu.vector_store %arg5[%c0_31, %c0_32], %46 {strides = array<i32>} : memref<8x128xf32, #tpu.memory_space<vmem>>, vector<8x128xf32>,
    } else {
    }
    return
  }
  func.func @transform_0(%arg0: i32) -> (i32, i32) {
    %c0_i32 = arith.constant 0 : i32
    %c0_i32_0 = arith.constant 0 : i32
    %c0_i32_1 = arith.constant 0 : i32
    return %c0_i32, %c0_i32_0 : i32, i32
  }
  func.func @transform_1(%arg0: i32) -> (i32, i32) {
    %c0_i32 = arith.constant 0 : i32
    %c0_i32_0 = arith.constant 0 : i32
    %c0_i32_1 = arith.constant 0 : i32
    return %c0_i32, %c0_i32_0 : i32, i32
  }
  func.func @transform_2(%arg0: i32) -> (i32, i32) {
    %c0_i32 = arith.constant 0 : i32
    %c0_i32_0 = arith.constant 0 : i32
    %c0_i32_1 = arith.constant 0 : i32
    return %c0_i32, %c0_i32_0 : i32, i32
  }
  func.func @transform_3(%arg0: i32) -> (i32, i32) {
    %c0_i32 = arith.constant 0 : i32
    %c0_i32_0 = arith.constant 0 : i32
    return %c0_i32, %arg0 : i32, i32
  }
  func.func @transform_4(%arg0: i32) -> (i32, i32) {
    %c0_i32 = arith.constant 0 : i32
    %c0_i32_0 = arith.constant 0 : i32
    %c0_i32_1 = arith.constant 0 : i32
    return %c0_i32, %c0_i32_0 : i32, i32
  }
}

</mosaic_0001>

<bundles_post_ra>
// kernel: resnet_block_forward.2
= control target key start
LH: loop header
LB: loop body
LE: loop exit
PB: predicated region body
PF: predicated region fallthrough
CT: control target
= control target key end

     0   :  { %vm50_vm0 = vcmask 392192   ;;  %vm22_vm1 = vcmask 7168   ;;  %v153_v4 = vmov 0.0   ;;  %v154_v8 = vmov 0   ;;  %s205_s3 = inlined_call_operand.vmem [shape: bf16[48,128], index: 3, kind: input, shape index: {}]   ;;  %s206_s0 = inlined_call_operand.vmem [shape: bf16[8,48], index: 0, kind: input, shape index: {}]   ;;  %s207_s1 = inlined_call_operand.vmem [shape: f32[8,1], index: 1, kind: input, shape index: {}]   ;;  %s208_s2 = inlined_call_operand.vmem [shape: f32[8,1], index: 2, kind: input, shape index: {}]   ;;  %s209_s4 = inlined_call_operand.vmem [shape: bf16[8,128], index: 4, kind: output, shape index: {}]  }
   0x1   :  { %v146_v0 = vld [vmem:[%s205_s3 + $0x10] sm:$0xff]  ;;  %v145_v1 = vld [vmem:[%s205_s3 + $0x8] sm:$0xff]  ;;  %v144_v2 = vld [vmem:[%s205_s3] sm:$0xff]  ;;  %23 = vst.msk [vmem:[#allocation3] sm:$0xff] %vm22_vm1, %v153_v4  ;;  %149 = vset.pattern.permute.xlu1 %v154_v8  ;;  %150 = vset.pattern.permute.xlu0 %v154_v8 }
   0x2   :  { %59 = vmatpush.bf16.msra.mxu0 %v146_v0  ;;  %v25_v3 = vld [vmem:[%s206_s0] sm:$0xf]  ;;  %24 = vst.msk [vmem:[#allocation4] sm:$0xff] %vm22_vm1, %v153_v4 }
   0x3   :  { %v94_v28 = vld [vmem:[%s207_s1] sm:$0xff] }
   0x4   :  { %v107_v33 = vld [vmem:[%s208_s2] sm:$0xff] }
   0x6   :  { %60 = vmatpush.bf16.msra.mxu0 %v145_v1 }
   0x8   :  { %v72_v9 = vld [vmem:[#allocation3] sm:$0xff] }
   0x9   :  { %v78_v12 = vld [vmem:[#allocation4] sm:$0xff] }
   0xa   :  { %61 = vmatpush.bf16.msra.mxu0 %v144_v2 }
   0xd   :  { %143 = vmatmul.msk.bf16.vlgmr.msra.gmra.mxu0 %vm50_vm0, %v25_v3 }
  0x8a   :  { %v63_v5 = vpop.f32.mrf.mxu0 }
  0x8b   :  { %73 = vadd.xlane.f32.xlu0 %v63_v5  ;;  %v79_v6 = vmul.f32 %v63_v5, %v63_v5 }
  0x92   :  { %v65_v7 = vpop.f32.mrf.mxu0 }
  0x93   :  { %80 = vadd.xlane.f32.xlu0 %v79_v6 }
  0xfe   :  { %v74_v10 = vpop.xlane.xlu0 %73 }
  0xff   :  { %v75_v11 = vadd.f32 %v74_v10, %v72_v9 }
 0x101   :  { %77 = vst.msk [vmem:[#allocation3] sm:$0xff] %vm22_vm1, %v75_v11 }
 0x106   :  { %v81_v13 = vpop.xlane.xlu0 %80 }
 0x107   :  { %v82_v14 = vadd.f32 %v81_v13, %v78_v12 }
 0x108   :  { %v87_v15 = vld [vmem:[#allocation3] sm:$0xff] }
 0x109   :  { %83 = vst.msk [vmem:[#allocation4] sm:$0xff] %vm22_vm1, %v82_v14  ;;  %v88_v16 = vmul.f32 0.0078125, %v87_v15 }
 0x10b   :  { %v91_v19 = vmul.f32 %v88_v16, %v88_v16 }
 0x110   :  { %v89_v17 = vld [vmem:[#allocation4] sm:$0xff] }
 0x111   :  { %v90_v18 = vmul.f32 0.0078125, %v89_v17 }
 0x113   :  { %v92_v20 = vsub.f32 %v90_v18, %v91_v19 }
 0x115   :  { %v93_v21 = vmax.f32 %v92_v20, 0.0 }
 0x117   :  { %v95_v22 = vadd.f32 1e-05, %v93_v21 }
 0x119   :  { %151 = vrsqrt.f32 %v95_v22  ;;  %vm102_vm3 = vweird.f32 %v95_v22 }
 0x11f   :  { %v152_v23 = vpop.eup %151 }
 0x120   :  { %v97_v24 = vmul.f32 %v152_v23, %v95_v22  ;;  %vm103_vm2 = vweird.f32 %v152_v23 }
 0x121   :  { %vm104_vm4 = vmor %vm102_vm3, %vm103_vm2 }
 0x122   :  { %v98_v25 = vmul.f32 %v152_v23, %v97_v24 }
 0x124   :  { %v99_v26 = vmul.f32 0.5, %v98_v25 }
 0x126   :  { %v100_v27 = vsub.f32 1.5, %v99_v26 }
 0x128   :  { %v101_v29 = vmul.f32 %v152_v23, %v100_v27 }
 0x12a   :  { %v105_v30 = vsel %vm104_vm4, %v152_v23, %v101_v29 }
 0x12b   :  { %v106_v31 = vmul.f32 %v105_v30, %v94_v28 }
 0x12d   :  { %113 = vperm.xlu1 %149, %v106_v31   ;;  %v108_v32 = vmul.f32 %v106_v31, %v88_v16 }
 0x12f   :  { %v109_v34 = vsub.f32 %v107_v33, %v108_v32 }
 0x135   :  { %119 = vperm.xlu1 %149, %v109_v34  }
 0x19f   :  { %v114_v35 = vpop.permute.xlu1 %113 }
 0x1a0   :  { %v116_v36 = vmul.f32 %v114_v35, %v63_v5 }
 0x1a7   :  { %v120_v37 = vpop.permute.xlu1 %119 }
 0x1a8   :  { %v122_v38 = vadd.f32 %v120_v37, %v116_v36 }
 0x1aa   :  { %v123_v39 = vmax.f32 %v122_v38, 0.0 }
 0x1ac   :  { %v124_v40 = vpack.c.bf16 %v123_v39, %v123_v39 }
 0x1ae   :  { %125 = vst [vmem:[%s209_s4] sm:$0xf] %v124_v40 }

// kernel: resnet_block_forward.3
= control target key start
LH: loop header
LB: loop body
LE: loop exit
PB: predicated region body
PF: predicated region fallthrough
CT: control target
= control target key end

     0   :  { %vm66_vm0 = vcmask 654336   ;;  %vm22_vm1 = vcmask 7168   ;;  %v177_v6 = vmov 0.0   ;;  %v178_v10 = vmov 0   ;;  %s235_s3 = inlined_call_operand.vmem [shape: bf16[80,128], index: 3, kind: input, shape index: {}]   ;;  %s236_s0 = inlined_call_operand.vmem [shape: bf16[8,80], index: 0, kind: input, shape index: {}]   ;;  %s237_s1 = inlined_call_operand.vmem [shape: f32[8,1], index: 1, kind: input, shape index: {}]   ;;  %s238_s2 = inlined_call_operand.vmem [shape: f32[8,1], index: 2, kind: input, shape index: {}]   ;;  %s239_s4 = inlined_call_operand.vmem [shape: f32[8,128], index: 4, kind: output, shape index: {}]  }
   0x1   :  { %v170_v0 = vld [vmem:[%s235_s3 + $0x20] sm:$0xff]  ;;  %v169_v1 = vld [vmem:[%s235_s3 + $0x18] sm:$0xff]  ;;  %v168_v2 = vld [vmem:[%s235_s3 + $0x10] sm:$0xff]  ;;  %23 = vst.msk [vmem:[#allocation3] sm:$0xff] %vm22_vm1, %v177_v6  ;;  %173 = vset.pattern.permute.xlu1 %v178_v10  ;;  %174 = vset.pattern.permute.xlu0 %v178_v10 }
   0x2   :  { %73 = vmatpush.bf16.msra.mxu0 %v170_v0  ;;  %v167_v3 = vld [vmem:[%s235_s3 + $0x8] sm:$0xff]  ;;  %v166_v4 = vld [vmem:[%s235_s3] sm:$0xff]  ;;  %24 = vst.msk [vmem:[#allocation4] sm:$0xff] %vm22_vm1, %v177_v6 }
   0x3   :  { %v25_v5 = vld [vmem:[%s236_s0] sm:$0xf] }
   0x4   :  { %v110_v30 = vld [vmem:[%s237_s1] sm:$0xff] }
   0x5   :  { %v123_v35 = vld [vmem:[%s238_s2] sm:$0xff] }
   0x6   :  { %74 = vmatpush.bf16.msra.mxu0 %v169_v1 }
   0x8   :  { %v88_v11 = vld [vmem:[#allocation3] sm:$0xff] }
   0x9   :  { %v94_v14 = vld [vmem:[#allocation4] sm:$0xff] }
   0xa   :  { %75 = vmatpush.bf16.msra.mxu0 %v168_v2 }
   0xe   :  { %76 = vmatpush.bf16.msra.mxu0 %v167_v3 }
  0x12   :  { %77 = vmatpush.bf16.msra.mxu0 %v166_v4 }
  0x15   :  { %165 = vmatmul.msk.bf16.vlgmr.msra.gmra.mxu0 %vm66_vm0, %v25_v5 }
  0x92   :  { %v79_v7 = vpop.f32.mrf.mxu0 }
  0x93   :  { %89 = vadd.xlane.f32.xlu0 %v79_v7  ;;  %v95_v8 = vmul.f32 %v79_v7, %v79_v7 }
  0x9a   :  { %v81_v9 = vpop.f32.mrf.mxu0 }
  0x9b   :  { %96 = vadd.xlane.f32.xlu0 %v95_v8 }
 0x106   :  { %v90_v12 = vpop.xlane.xlu0 %89 }
 0x107   :  { %v91_v13 = vadd.f32 %v90_v12, %v88_v11 }
 0x109   :  { %93 = vst.msk [vmem:[#allocation3] sm:$0xff] %vm22_vm1, %v91_v13 }
 0x10e   :  { %v97_v15 = vpop.xlane.xlu0 %96 }
 0x10f   :  { %v98_v16 = vadd.f32 %v97_v15, %v94_v14 }
 0x110   :  { %v103_v17 = vld [vmem:[#allocation3] sm:$0xff] }
 0x111   :  { %99 = vst.msk [vmem:[#allocation4] sm:$0xff] %vm22_vm1, %v98_v16  ;;  %v104_v18 = vmul.f32 0.0078125, %v103_v17 }
 0x113   :  { %v107_v21 = vmul.f32 %v104_v18, %v104_v18 }
 0x118   :  { %v105_v19 = vld [vmem:[#allocation4] sm:$0xff] }
 0x119   :  { %v106_v20 = vmul.f32 0.0078125, %v105_v19 }
 0x11b   :  { %v108_v22 = vsub.f32 %v106_v20, %v107_v21 }
 0x11d   :  { %v109_v23 = vmax.f32 %v108_v22, 0.0 }
 0x11f   :  { %v111_v24 = vadd.f32 1e-05, %v109_v23 }
 0x121   :  { %175 = vrsqrt.f32 %v111_v24  ;;  %vm118_vm3 = vweird.f32 %v111_v24 }
 0x127   :  { %v176_v25 = vpop.eup %175 }
 0x128   :  { %v113_v26 = vmul.f32 %v176_v25, %v111_v24  ;;  %vm119_vm2 = vweird.f32 %v176_v25 }
 0x129   :  { %vm120_vm4 = vmor %vm118_vm3, %vm119_vm2 }
 0x12a   :  { %v114_v27 = vmul.f32 %v176_v25, %v113_v26 }
 0x12c   :  { %v115_v28 = vmul.f32 0.5, %v114_v27 }
 0x12e   :  { %v116_v29 = vsub.f32 1.5, %v115_v28 }
 0x130   :  { %v117_v31 = vmul.f32 %v176_v25, %v116_v29 }
 0x132   :  { %v121_v32 = vsel %vm120_vm4, %v176_v25, %v117_v31 }
 0x133   :  { %v122_v33 = vmul.f32 %v121_v32, %v110_v30 }
 0x135   :  { %129 = vperm.xlu1 %173, %v122_v33   ;;  %v124_v34 = vmul.f32 %v122_v33, %v104_v18 }
 0x137   :  { %v125_v36 = vsub.f32 %v123_v35, %v124_v34 }
 0x13d   :  { %135 = vperm.xlu1 %173, %v125_v36  }
 0x1a7   :  { %v130_v37 = vpop.permute.xlu1 %129 }
 0x1a8   :  { %v132_v38 = vmul.f32 %v130_v37, %v79_v7 }
 0x1af   :  { %v136_v39 = vpop.permute.xlu1 %135 }
 0x1b0   :  { %v138_v40 = vadd.f32 %v136_v39, %v132_v38 }
 0x1b2   :  { %139 = vst [vmem:[%s239_s4] sm:$0xff] %v138_v40 }

</bundles_post_ra>
